<compile_context>
chip_gen: v5e
topology: v5e:2x2
jax: 0.10.0
libtpu: 0.0.40
codegen_flags: <defaults>
</compile_context>

<pallas_src>
import jax
import jax.numpy as jnp
from jax.experimental import pallas as pl
from jax.experimental.pallas import tpu as pltpu


# ---------------------------------------------------------------------------
# Kernel body (shared by both the un-gridded and the batch-tiled variants)
# ---------------------------------------------------------------------------
def linear_kernel(x_ref, wt_ref, b_ref, o_ref):
    # x_ref : (B_or_TB, IN)  f32
    # wt_ref: (IN, OUT)      f32, contraction-major (pre-transposed once)
    # b_ref : (1, OUT)       f32
    # o_ref : (B_or_TB, OUT) f32
    acc = jnp.dot(x_ref[...], wt_ref[...], preferred_element_type=jnp.float32)
    o_ref[...] = (acc + b_ref[...]).astype(o_ref.dtype)


# ---------------------------------------------------------------------------
# One-time parameter preparation (amortized across calls, like module init)
# ---------------------------------------------------------------------------
def prepare_linear_params(weight, bias):
    """weight: (OUT, IN) PyTorch layout, bias: (OUT,).

    Returns (wt, b) = ((IN, OUT) contraction-major weight, (1, OUT) bias),
    ready to be fed to the kernel without any per-call layout work.
    """
    wt = jnp.asarray(weight).T                # (IN, OUT)
    b = jnp.asarray(bias).reshape(1, -1)      # (1, OUT)
    return wt, b


def _cost(B, IN, OUT, itemsize=4):
    return pl.CostEstimate(
        flops=2 * B * IN * OUT,
        transcendentals=0,
        bytes_accessed=itemsize * (B * IN + IN * OUT + OUT + B * OUT),
    )


# ---------------------------------------------------------------------------
# Small-batch path: single un-gridded invocation, whole arrays in VMEM.
# ---------------------------------------------------------------------------
def linear_pallas_small(x, wt, b):
    B, IN = x.shape
    OUT = wt.shape[1]
    return pl.pallas_call(
        linear_kernel,
        out_shape=jax.ShapeDtypeStruct((B, OUT), x.dtype),
        in_specs=[
            pl.BlockSpec(memory_space=pltpu.MemorySpace.VMEM),
            pl.BlockSpec(memory_space=pltpu.MemorySpace.VMEM),
            pl.BlockSpec(memory_space=pltpu.MemorySpace.VMEM),
        ],
        out_specs=pl.BlockSpec(memory_space=pltpu.MemorySpace.VMEM),
        cost_estimate=_cost(B, IN, OUT),
    )(x, wt, b)


# ---------------------------------------------------------------------------
# Large-batch path: batch-tiled grid, weight/bias VMEM-resident across steps.
#   TB=512 rows -> ~85% of measured HBM roofline on v6e; double-buffered f32
#   buffers are ~TB*80 B here so this fits comfortably inside the 32 MiB scoped
#   VMEM default on v5e/v6e/v7x (no vmem_limit_bytes override needed).
# ---------------------------------------------------------------------------
def linear_pallas_tiled(x, wt, b, *, tb=512):
    B, IN = x.shape
    OUT = wt.shape[1]
    grid = (pl.cdiv(B, tb),)
    return pl.pallas_call(
        linear_kernel,
        out_shape=jax.ShapeDtypeStruct((B, OUT), x.dtype),
        grid_spec=pltpu.PrefetchScalarGridSpec(
            num_scalar_prefetch=0,
            grid=grid,
            in_specs=[
                pl.BlockSpec((tb, IN), lambda i: (i, 0)),   # streamed batch tile
                pl.BlockSpec((IN, OUT), lambda i: (0, 0)),  # weight stays resident
                pl.BlockSpec((1, OUT), lambda i: (0, 0)),   # bias stays resident
            ],
            out_specs=pl.BlockSpec((tb, OUT), lambda i: (i, 0)),
        ),
        compiler_params=pltpu.CompilerParams(
            dimension_semantics=("parallel",),  # shards batch across TCs on v7x
        ),
        cost_estimate=_cost(B, IN, OUT),
    )(x, wt, b)


def linear_pallas(x, wt, b, *, tb=512):
    """x: (B, IN) f32; wt: (IN, OUT) f32 (from prepare_linear_params); b: (1, OUT)."""
    B = x.shape[0]
    if B <= tb:
        return linear_pallas_small(x, wt, b)
    return linear_pallas_tiled(x, wt, b, tb=tb)


def reference(x, weight, bias):
    return x @ weight.T + bias


if __name__ == "__main__":
    key = jax.random.PRNGKey(0)
    kx, kw, kb, kx2 = jax.random.split(key, 4)

    batch = 8
    in_features = 10
    out_features = 10

    # Deterministic inputs / "parameters" (nn.Linear shapes: W (10,10), b (10,))
    x = jax.random.normal(kx, (batch, in_features), dtype=jnp.float32)
    bound = 1.0 / jnp.sqrt(in_features)
    weight = jax.random.uniform(
        kw, (out_features, in_features), dtype=jnp.float32, minval=-bound, maxval=bound
    )
    bias = jax.random.uniform(
        kb, (out_features,), dtype=jnp.float32, minval=-bound, maxval=bound
    )

    # One-time parameter prep (module-init time, NOT per forward call).
    wt, b = prepare_linear_params(weight, bias)
    wt, b = jax.block_until_ready((wt, b))

    # --- small-batch path (the MyModel forward as specified) ---
    out = linear_pallas(x, wt, b)
    out = jax.block_until_ready(out)
    ref = reference(x, weight, bias)
    assert out.shape == (batch, out_features)
    assert jnp.allclose(out, ref, atol=1e-5, rtol=1e-5), "small-path mismatch vs reference"

    # --- batch-tiled path smoke test (resident weights, parallel batch axis) ---
    big_batch = 1024
    x_big = jax.random.normal(kx2, (big_batch, in_features), dtype=jnp.float32)
    out_big = linear_pallas(x_big, wt, b, tb=512)
    out_big = jax.block_until_ready(out_big)
    ref_big = reference(x_big, weight, bias)
    assert out_big.shape == (big_batch, out_features)
    assert jnp.allclose(out_big, ref_big, atol=1e-5, rtol=1e-5), "tiled-path mismatch vs reference"

    print("KERNEL_OK")
</pallas_src>

<mosaic_0001>
module attributes {stable_mosaic.version = 11 : i64} {
  func.func @linear_kernel(%arg0: memref<8x10xf32, #tpu.memory_space<vmem>>, %arg1: memref<10x10xf32, #tpu.memory_space<vmem>>, %arg2: memref<1x10xf32, #tpu.memory_space<vmem>>, %arg3: memref<8x10xf32, #tpu.memory_space<vmem>>) attributes {dimension_semantics = [], scalar_prefetch = 0 : i64, scratch_operands = 0 : i64, tpu.core_type = #tpu.core_type<tc>} {
    %c0 = arith.constant 0 : index
    %c0_0 = arith.constant 0 : index
    %0 = vector.load %arg0[%c0, %c0_0] : memref<8x10xf32, #tpu.memory_space<vmem>>, vector<8x10xf32>
    %c0_1 = arith.constant 0 : index
    %c0_2 = arith.constant 0 : index
    %1 = vector.load %arg1[%c0_1, %c0_2] : memref<10x10xf32, #tpu.memory_space<vmem>>, vector<10x10xf32>
    %cst = arith.constant dense<0.000000e+00> : vector<8x10xf32>
    %2 = tpu.matmul %0, %1, %cst {dimension_numbers = #tpu.dot_dimension_numbers<[1], [0], [0], [1], [0, 0, 1, 1], [], []>} : vector<8x10xf32>, vector<10x10xf32>, vector<8x10xf32> -> vector<8x10xf32>
    %c0_3 = arith.constant 0 : index
    %c0_4 = arith.constant 0 : index
    %3 = vector.load %arg2[%c0_3, %c0_4] : memref<1x10xf32, #tpu.memory_space<vmem>>, vector<1x10xf32>
    %4 = vector.broadcast %3 : vector<1x10xf32> to vector<8x10xf32>
    %5 = arith.addf %2, %4 : vector<8x10xf32>
    %c0_5 = arith.constant 0 : index
    %c0_6 = arith.constant 0 : index
    %6 = vector.load %arg3[%c0_5, %c0_6] : memref<8x10xf32, #tpu.memory_space<vmem>>, vector<8x10xf32>
    tpu.vector_store %arg3[%c0_5, %c0_6], %5 {strides = array<i32>} : memref<8x10xf32, #tpu.memory_space<vmem>>, vector<8x10xf32>,
    return
  }
}

</mosaic_0001>

<bundles_post_ra>
// kernel: tpu_custom_call.1
= control target key start
LH: loop header
LB: loop body
LE: loop exit
PB: predicated region body
PF: predicated region fallthrough
CT: control target
= control target key end

     0   :  { %8 = vsyncpa [#allocation3], 0  ;;  %s222_s0 = inlined_call_operand.hbm [shape: f32[8,10], index: 0, kind: input, shape index: {}]   ;;  %s223_s1 = inlined_call_operand.hbm [shape: f32[10,10], index: 1, kind: input, shape index: {}]   ;;  %s224_s2 = inlined_call_operand.vmem [shape: f32[1,10], index: 2, kind: input, shape index: {}]   ;;  %s225_s3 = inlined_call_operand.hbm [shape: f32[8,10], index: 3, kind: output, shape index: {}]  }
   0x1   :  { %9 = vsyncpa [#allocation6], 0 }
   0x2   :  { %10 = vsyncpa [#allocation4], 0  ;;  %s16_s14 = sshll.u32 %s222_s0, 4  ;;  %s185_s15 = smov [#allocation2]   ;;  %s17_s14 = int_to_ptr.hbm [resolvable:$true] %s16_s14 }
   0x3   :  { %s18_s16 = sshll.u32 %s185_s15, 4  ;;  %s26_s19 = sshll.u32 %s223_s1, 4  ;;  %s19_s16 = int_to_ptr.vmem [resolvable:$true] %s18_s16  ;;  %s27_s19 = int_to_ptr.hbm [resolvable:$true] %s26_s19 }
   0x4   :  { %21 = dma.hbm_to_vmem [thread:$0]  %s17_s14, 128, %s19_s16, [#allocation3]  }
   0x5   :  { %s186_s20 = smov [#allocation5]   ;;  %s187_s22 = smov 128  }
   0x6   :  { %s28_s21 = sshll.u32 %s186_s20, 4  ;;  %s188_s23 = smov 8   ;;  %s29_s21 = int_to_ptr.vmem [resolvable:$true] %s28_s21 }
   0x7   :  { %34 = dma.hbm_to_vmem [thread:$0]  %s27_s19, 256, %s29_s21, [#allocation6], %s187_s22, %s187_s22, %s188_s23  }
   0x8   :  { %179 = dma.done.wait [#allocation3], 128  }
   0x9   :  { %180 = vsyncadd [#allocation3], 4294967168 }
   0xa   :  { %181 = dma.done.wait [#allocation6], 256  }
   0xb   :  { %182 = vsyncadd [#allocation6], 4294967040  ;;  %vm56_vm0 = vcmask 1041408   ;;  %v47_v0 = vld [vmem:[#allocation5 + $0x8] sm:$0x3]  ;;  %v46_v1 = vld [vmem:[#allocation5] sm:$0xff] }
   0xc   :  { %99 = vmatpush.msk.msra.mxu0 %vm56_vm0, %v47_v0  ;;  %v45_v2 = vld [vmem:[#allocation2] sm:$0xff]  ;;  %vm52_vm1 = vcmask 80896   ;;  %s189_s24 = smov [#allocation7]   ;;  %s88_s28 = sshll.u32 %s225_s3, 4  ;;  %s89_s28 = int_to_ptr.hbm [resolvable:$true] %s88_s28 }
   0xd   :  { %v106_v3 = vld [vmem:[%s224_s2] ss:$0 sm:$0xff]  ;;  %s86_s25 = sshll.u32 %s189_s24, 4  ;;  %s87_s25 = int_to_ptr.vmem [resolvable:$true] %s86_s25 }
   0xe   :  { %75 = vmatpush.msra.mxu0 %v46_v1 }
   0xf   :  { %100 = vmatmul.msk.f32.vlgmr.msra.gmra.mxu0 %vm52_vm1, %v45_v2 }
  0x8c   :  { %v77_v4 = vpop.f32.mrf.mxu0 }
  0x8d   :  { %v78_v5 = vadd.f32 %v106_v3, %v77_v4 }
  0x8f   :  { %80 = vst.msk [vmem:[#allocation7] sm:$0xff] %vm52_vm1, %v78_v5 }
  0x90   :  { %91 = dma.vmem_to_hbm [thread:$0]  %s87_s25, 128, %s89_s28, [#allocation4]  }
  0x91   :  { %183 = dma.done.wait [#allocation4], 128  }
  0x92   :  { %184 = vsyncadd [#allocation4], 4294967168 }
  0x93   :  { %96 = vsyncpa [#allocation3], 1 }
  0x94   :  { %97 = vsyncpa [#allocation6], 1 }
  0x95   :  { %98 = vsyncpa [#allocation4], 1 }

</bundles_post_ra>
